<compile_context>
chip_gen: v7x
topology: tpu7x:2x2x1
jax: 0.10.0
libtpu: 0.0.40
codegen_flags: <defaults>
</compile_context>

<pallas_src>
import jax
import jax.numpy as jnp
from jax.experimental import pallas as pl
from jax.experimental.pallas import tpu as pltpu

STATE_DIM = 12
HIDDEN_DIM = 128
HALF_DIM = HIDDEN_DIM // 2
ACTION_DIM = 5
LN_EPS = 1e-5


def _round_up(n, m):
    return ((n + m - 1) // m) * m


def _layernorm(h, gamma, beta):
    mu = jnp.mean(h, axis=-1, keepdims=True)
    var = jnp.mean((h - mu) * (h - mu), axis=-1, keepdims=True)
    return (h - mu) * jax.lax.rsqrt(var + LN_EPS) * gamma + beta


def dqn_kernel(x_ref, w_ref, p_ref, q_ref):
    # x_ref: (tile_b, 128) compute dtype (state zero-padded 12 -> 128 lanes)
    # w_ref: (4, 128, 128) compute dtype
    #        [w1_pad, w2, wv1||wa1, folded dueling output layer]
    # p_ref: (8, 128) f32  [b1, g1, be1, b2, g2, be2, bv1||ba1, folded out bias]
    # q_ref: (tile_b, 128) f32 lane-dense output (Q-values in columns 0:ACTION_DIM)
    x = x_ref[...]
    w1 = w_ref[0]
    w2 = w_ref[1]
    w3 = w_ref[2]
    w4 = w_ref[3]
    p = p_ref[...]
    b1, g1, be1 = p[0:1, :], p[1:2, :], p[2:3, :]
    b2, g2, be2 = p[3:4, :], p[4:5, :], p[5:6, :]
    b3, b4 = p[6:7, :], p[7:8, :]

    # ---- state encoder (f32 accumulation, f32 LayerNorm) ----
    h = jnp.dot(x, w1, preferred_element_type=jnp.float32) + b1
    h = jnp.maximum(h, 0.0)
    h = _layernorm(h, g1, be1)
    # Dropout(0.3): identity in eval mode.
    h = jnp.dot(h.astype(w2.dtype), w2, preferred_element_type=jnp.float32) + b2
    h = jnp.maximum(h, 0.0)
    feat = _layernorm(h, g2, be2)

    # ---- fused value + advantage streams ----
    va = jnp.dot(feat.astype(w3.dtype), w3, preferred_element_type=jnp.float32) + b3
    va = jnp.maximum(va, 0.0)
    # Dueling combine (value + centered advantages) is folded into w4/b4, so this
    # matmul produces Q-values directly in columns 0:ACTION_DIM (rest is 0).
    q_ref[...] = jnp.dot(va.astype(w4.dtype), w4,
                         preferred_element_type=jnp.float32) + b4


def traffic_dqn_forward(x, W, P, *, tile_b=1024):
    """x: (B, STATE_DIM) f32. W: (4,128,128), P: (8,128) from pack_params.

    Returns (B, ACTION_DIM) f32 Q-values.
    """
    B = x.shape[0]
    compute_dtype = W.dtype

    tile_b = max(8, min(tile_b, _round_up(B, 8)))
    Bp = _round_up(B, tile_b)
    grid = (Bp // tile_b,)

    # Zero-pad batch to a tile multiple and the contraction dim 12 -> 128.
    xp = jnp.zeros((Bp, HIDDEN_DIM), compute_dtype)
    xp = xp.at[:B, :STATE_DIM].set(x.astype(compute_dtype))

    itemsize = jnp.dtype(compute_dtype).itemsize
    cost = pl.CostEstimate(
        flops=2 * Bp * HIDDEN_DIM * HIDDEN_DIM * 4 + 16 * Bp * HIDDEN_DIM,
        transcendentals=2 * Bp,  # one rsqrt per LayerNorm per row
        bytes_accessed=(Bp * HIDDEN_DIM * itemsize               # x
                        + 4 * HIDDEN_DIM * HIDDEN_DIM * itemsize  # W
                        + 8 * HIDDEN_DIM * 4                      # P
                        + Bp * HIDDEN_DIM * 4),                   # out
    )

    out = pl.pallas_call(
        dqn_kernel,
        out_shape=jax.ShapeDtypeStruct((Bp, HIDDEN_DIM), jnp.float32),
        grid_spec=pltpu.PrefetchScalarGridSpec(
            num_scalar_prefetch=0,
            grid=grid,
            in_specs=[
                pl.BlockSpec((tile_b, HIDDEN_DIM), lambda i: (i, 0)),
                pl.BlockSpec((4, HIDDEN_DIM, HIDDEN_DIM), lambda i: (0, 0, 0)),
                pl.BlockSpec((8, HIDDEN_DIM), lambda i: (0, 0)),
            ],
            out_specs=pl.BlockSpec((tile_b, HIDDEN_DIM), lambda i: (i, 0)),
        ),
        compiler_params=pltpu.CompilerParams(
            dimension_semantics=("parallel",),
        ),
        cost_estimate=cost,
    )(xp, W, P)

    return out[:B, :ACTION_DIM]


def init_params(key):
    """Deterministic init mirroring TrafficDQN.__init__ / _init_weights.

    Linear weights: kaiming_normal_ with a=0.01 (fan_in mode), biases = 0.
    LayerNorm: gamma = 1, beta = 0.
    Weights stored transposed, as (in_features, out_features).
    """
    a = 0.01
    gain = (2.0 / (1.0 + a * a)) ** 0.5

    def linear_w(key, fan_in, fan_out):
        std = gain / (fan_in ** 0.5)
        # PyTorch weight is (out, in); sample there then transpose to (in, out).
        w = std * jax.random.normal(key, (fan_out, fan_in), dtype=jnp.float32)
        return w.T

    keys = jax.random.split(key, 6)
    h, h2 = HIDDEN_DIM, HALF_DIM
    return {
        # state_encoder
        "w1": linear_w(keys[0], STATE_DIM, h),
        "b1": jnp.zeros((1, h), jnp.float32),
        "g1": jnp.ones((1, h), jnp.float32),
        "be1": jnp.zeros((1, h), jnp.float32),
        "w2": linear_w(keys[1], h, h),
        "b2": jnp.zeros((1, h), jnp.float32),
        "g2": jnp.ones((1, h), jnp.float32),
        "be2": jnp.zeros((1, h), jnp.float32),
        # value stream
        "wv1": linear_w(keys[2], h, h2),
        "bv1": jnp.zeros((1, h2), jnp.float32),
        "wv2": linear_w(keys[3], h2, 1),
        "bv2": jnp.zeros((1, 1), jnp.float32),
        # advantage stream
        "wa1": linear_w(keys[4], h, h2),
        "ba1": jnp.zeros((1, h2), jnp.float32),
        "wa2": linear_w(keys[5], h2, ACTION_DIM),
        "ba2": jnp.zeros((1, ACTION_DIM), jnp.float32),
    }


def pack_params(p, compute_dtype=jnp.float32):
    """Pack the 16 PyTorch-style params into one weight stack + one bias slab.

    W: (4, 128, 128) compute_dtype
       [0] w1 zero-padded from (12,128) to (128,128)
       [1] w2 (128,128)
       [2] wv1 || wa1 concatenated on out-features -> (128,128)
       [3] folded dueling output layer (see below); only columns 0:ACTION_DIM used
    P: (8, 128) f32  rows = [b1, g1, be1, b2, g2, be2, bv1||ba1, folded out bias]

    The dueling combine  q = value + (adv - mean(adv))  is linear in the last
    layer, so it is folded into W[3] / P[7]:
       W[3][:64, a] = wv2            (value contribution, same for every action)
       W[3][64:, a] = wa2[:, a] - mean_b wa2[:, b]
       P[7][a]      = bv2 + ba2[a] - mean(ba2)
    """
    h, h2, A = HIDDEN_DIM, HALF_DIM, ACTION_DIM

    w1p = jnp.zeros((h, h), jnp.float32).at[:STATE_DIM, :].set(p["w1"])
    wva1 = jnp.concatenate([p["wv1"], p["wa1"]], axis=1)          # (128, 128)
    bva1 = jnp.concatenate([p["bv1"], p["ba1"]], axis=1)          # (1, 128)

    wa2c = p["wa2"] - jnp.mean(p["wa2"], axis=1, keepdims=True)   # (64, A)
    ba2c = p["ba2"] - jnp.mean(p["ba2"], axis=1, keepdims=True)   # (1, A)

    w_out = jnp.zeros((h, h), jnp.float32)
    w_out = w_out.at[:h2, :A].set(jnp.broadcast_to(p["wv2"], (h2, A)))
    w_out = w_out.at[h2:, :A].set(wa2c)
    b_out = jnp.zeros((1, h), jnp.float32)
    b_out = b_out.at[0, :A].set(p["bv2"][0, 0] + ba2c[0])

    W = jnp.stack([w1p, p["w2"], wva1, w_out]).astype(compute_dtype)   # (4,128,128)
    P = jnp.concatenate(
        [p["b1"], p["g1"], p["be1"], p["b2"], p["g2"], p["be2"], bva1, b_out],
        axis=0,
    ).astype(jnp.float32)                                              # (8,128)
    return W, P


def reference_forward(x, p, compute_dtype=jnp.float32):
    """Pure-JAX reference of the original dueling DQN (matmul operands in
    compute_dtype, f32 accumulation). Kept unfused so the kernel is validated
    against the original math."""

    def mm(a, w):
        return jnp.dot(a.astype(compute_dtype), w.astype(compute_dtype),
                       preferred_element_type=jnp.float32)

    def ln(h, g, b):
        mu = jnp.mean(h, axis=-1, keepdims=True)
        var = jnp.mean((h - mu) ** 2, axis=-1, keepdims=True)
        return (h - mu) / jnp.sqrt(var + LN_EPS) * g + b

    h = jnp.maximum(mm(x, p["w1"]) + p["b1"], 0.0)
    h = ln(h, p["g1"], p["be1"])
    h = jnp.maximum(mm(h, p["w2"]) + p["b2"], 0.0)
    feat = ln(h, p["g2"], p["be2"])
    vh = jnp.maximum(mm(feat, p["wv1"]) + p["bv1"], 0.0)
    value = mm(vh, p["wv2"]) + p["bv2"]
    ah = jnp.maximum(mm(feat, p["wa1"]) + p["ba1"], 0.0)
    adv = mm(ah, p["wa2"]) + p["ba2"]
    return value + (adv - jnp.mean(adv, axis=-1, keepdims=True))


if __name__ == "__main__":
    key = jax.random.PRNGKey(0)
    pkey, xkey = jax.random.split(key)

    params = init_params(pkey)

    B = 16  # small demo batch -> single grid step; large batches tile at 1024 rows
    x = jax.random.normal(xkey, (B, STATE_DIM), dtype=jnp.float32)

    # ---- f32 path (all chips): tight correctness check vs pure-JAX reference ----
    W32, P32 = pack_params(params, jnp.float32)
    q32 = jax.block_until_ready(traffic_dqn_forward(x, W32, P32))
    q_ref32 = reference_forward(x, params, jnp.float32)
    assert q32.shape == (B, ACTION_DIM)
    assert jnp.allclose(q32, q_ref32, atol=1e-4, rtol=1e-4), "f32 mismatch vs reference"

    # ---- bf16 matmul operands (v6e/v7x perf path); keep f32 on v5-class chips ----
    device_kind = jax.devices()[0].device_kind.lower()
    if "v5" not in device_kind:
        Wb, Pb = pack_params(params, jnp.bfloat16)
        qb = jax.block_until_ready(traffic_dqn_forward(x, Wb, Pb))
        q_refb = reference_forward(x, params, jnp.bfloat16)
        assert jnp.allclose(qb, q_refb, atol=2e-2, rtol=2e-2), "bf16 mismatch vs reference"

    print("KERNEL_OK")
</pallas_src>

<mosaic_0001>
module attributes {stable_mosaic.version = 11 : i64} {
  func.func @dqn_kernel(%arg0: i32, %arg1: memref<16x128xf32, #tpu.memory_space<vmem>>, %arg2: memref<4x128x128xf32, #tpu.memory_space<vmem>>, %arg3: memref<8x128xf32, #tpu.memory_space<vmem>>, %arg4: memref<16x128xf32, #tpu.memory_space<vmem>>) attributes {dimension_semantics = [#tpu.dimension_semantics<parallel>], iteration_bounds = array<i64: 1>, scalar_prefetch = 0 : i64, scratch_operands = 0 : i64, tpu.core_type = #tpu.core_type<tc>, window_params = [{transform_indices = @transform_0, window_bounds = array<i64: 16, 128>}, {pipeline_mode = #tpu.pipeline_mode<synchronous>, transform_indices = @transform_1, window_bounds = array<i64: 4, 128, 128>}, {pipeline_mode = #tpu.pipeline_mode<synchronous>, transform_indices = @transform_2, window_bounds = array<i64: 8, 128>}, {transform_indices = @transform_3, window_bounds = array<i64: 16, 128>}]} {
    %c0 = arith.constant 0 : index
    %c0_0 = arith.constant 0 : index
    %0 = vector.load %arg1[%c0, %c0_0] : memref<16x128xf32, #tpu.memory_space<vmem>>, vector<16x128xf32>
    %c0_1 = arith.constant 0 : index
    %c0_2 = arith.constant 0 : index
    %c0_3 = arith.constant 0 : index
    %1 = vector.load %arg2[%c0_1, %c0_2, %c0_3] : memref<4x128x128xf32, #tpu.memory_space<vmem>>, vector<1x128x128xf32>
    %2 = vector.shape_cast %1 : vector<1x128x128xf32> to vector<128x128xf32>
    %c1 = arith.constant 1 : index
    %c0_4 = arith.constant 0 : index
    %c0_5 = arith.constant 0 : index
    %3 = vector.load %arg2[%c1, %c0_4, %c0_5] : memref<4x128x128xf32, #tpu.memory_space<vmem>>, vector<1x128x128xf32>
    %4 = vector.shape_cast %3 : vector<1x128x128xf32> to vector<128x128xf32>
    %c2 = arith.constant 2 : index
    %c0_6 = arith.constant 0 : index
    %c0_7 = arith.constant 0 : index
    %5 = vector.load %arg2[%c2, %c0_6, %c0_7] : memref<4x128x128xf32, #tpu.memory_space<vmem>>, vector<1x128x128xf32>
    %6 = vector.shape_cast %5 : vector<1x128x128xf32> to vector<128x128xf32>
    %c3 = arith.constant 3 : index
    %c0_8 = arith.constant 0 : index
    %c0_9 = arith.constant 0 : index
    %7 = vector.load %arg2[%c3, %c0_8, %c0_9] : memref<4x128x128xf32, #tpu.memory_space<vmem>>, vector<1x128x128xf32>
    %8 = vector.shape_cast %7 : vector<1x128x128xf32> to vector<128x128xf32>
    %c0_10 = arith.constant 0 : index
    %c0_11 = arith.constant 0 : index
    %9 = vector.load %arg3[%c0_10, %c0_11] : memref<8x128xf32, #tpu.memory_space<vmem>>, vector<8x128xf32>
    %10 = vector.extract_strided_slice %9 {offsets = [0, 0], sizes = [1, 128], strides = [1, 1]} : vector<8x128xf32> to vector<1x128xf32>
    %11 = vector.extract_strided_slice %9 {offsets = [1, 0], sizes = [1, 128], strides = [1, 1]} : vector<8x128xf32> to vector<1x128xf32>
    %12 = vector.extract_strided_slice %9 {offsets = [2, 0], sizes = [1, 128], strides = [1, 1]} : vector<8x128xf32> to vector<1x128xf32>
    %13 = vector.extract_strided_slice %9 {offsets = [3, 0], sizes = [1, 128], strides = [1, 1]} : vector<8x128xf32> to vector<1x128xf32>
    %14 = vector.extract_strided_slice %9 {offsets = [4, 0], sizes = [1, 128], strides = [1, 1]} : vector<8x128xf32> to vector<1x128xf32>
    %15 = vector.extract_strided_slice %9 {offsets = [5, 0], sizes = [1, 128], strides = [1, 1]} : vector<8x128xf32> to vector<1x128xf32>
    %16 = vector.extract_strided_slice %9 {offsets = [6, 0], sizes = [1, 128], strides = [1, 1]} : vector<8x128xf32> to vector<1x128xf32>
    %17 = vector.extract_strided_slice %9 {offsets = [7, 0], sizes = [1, 128], strides = [1, 1]} : vector<8x128xf32> to vector<1x128xf32>
    %cst = arith.constant dense<0.000000e+00> : vector<16x128xf32>
    %18 = tpu.matmul %0, %2, %cst {dimension_numbers = #tpu.dot_dimension_numbers<[1], [0], [0], [1], [0, 0, 1, 1], [], []>} : vector<16x128xf32>, vector<128x128xf32>, vector<16x128xf32> -> vector<16x128xf32>
    %19 = vector.broadcast %10 : vector<1x128xf32> to vector<16x128xf32>
    %20 = arith.addf %18, %19 : vector<16x128xf32>
    %cst_12 = arith.constant 0.000000e+00 : f32
    %21 = vector.broadcast %cst_12 : f32 to vector<16x128xf32>
    %22 = arith.maximumf %20, %21 : vector<16x128xf32>
    %cst_13 = arith.constant dense<0.000000e+00> : vector<16xf32>
    %23 = vector.multi_reduction <add>, %22, %cst_13 [1] : vector<16x128xf32> to vector<16xf32>
    %24 = vector.shape_cast %23 : vector<16xf32> to vector<16x1xf32>
    %cst_14 = arith.constant 1.280000e+02 : f32
    %25 = vector.broadcast %cst_14 : f32 to vector<16x1xf32>
    %26 = arith.divf %24, %25 : vector<16x1xf32>
    %27 = vector.broadcast %26 : vector<16x1xf32> to vector<16x128xf32>
    %28 = arith.subf %22, %27 : vector<16x128xf32>
    %29 = vector.broadcast %26 : vector<16x1xf32> to vector<16x128xf32>
    %30 = arith.subf %22, %29 : vector<16x128xf32>
    %31 = arith.mulf %28, %30 : vector<16x128xf32>
    %cst_15 = arith.constant dense<0.000000e+00> : vector<16xf32>
    %32 = vector.multi_reduction <add>, %31, %cst_15 [1] : vector<16x128xf32> to vector<16xf32>
    %33 = vector.shape_cast %32 : vector<16xf32> to vector<16x1xf32>
    %cst_16 = arith.constant 1.280000e+02 : f32
    %34 = vector.broadcast %cst_16 : f32 to vector<16x1xf32>
    %35 = arith.divf %33, %34 : vector<16x1xf32>
    %36 = vector.broadcast %26 : vector<16x1xf32> to vector<16x128xf32>
    %37 = arith.subf %22, %36 : vector<16x128xf32>
    %cst_17 = arith.constant 9.99999974E-6 : f32
    %38 = vector.broadcast %cst_17 : f32 to vector<16x1xf32>
    %39 = arith.addf %35, %38 : vector<16x1xf32>
    %40 = math.rsqrt %39 : vector<16x1xf32>
    %41 = vector.broadcast %40 : vector<16x1xf32> to vector<16x128xf32>
    %42 = arith.mulf %37, %41 : vector<16x128xf32>
    %43 = vector.broadcast %11 : vector<1x128xf32> to vector<16x128xf32>
    %44 = arith.mulf %42, %43 : vector<16x128xf32>
    %45 = vector.broadcast %12 : vector<1x128xf32> to vector<16x128xf32>
    %46 = arith.addf %44, %45 : vector<16x128xf32>
    %cst_18 = arith.constant dense<0.000000e+00> : vector<16x128xf32>
    %47 = tpu.matmul %46, %4, %cst_18 {dimension_numbers = #tpu.dot_dimension_numbers<[1], [0], [0], [1], [0, 0, 1, 1], [], []>} : vector<16x128xf32>, vector<128x128xf32>, vector<16x128xf32> -> vector<16x128xf32>
    %48 = vector.broadcast %13 : vector<1x128xf32> to vector<16x128xf32>
    %49 = arith.addf %47, %48 : vector<16x128xf32>
    %cst_19 = arith.constant 0.000000e+00 : f32
    %50 = vector.broadcast %cst_19 : f32 to vector<16x128xf32>
    %51 = arith.maximumf %49, %50 : vector<16x128xf32>
    %cst_20 = arith.constant dense<0.000000e+00> : vector<16xf32>
    %52 = vector.multi_reduction <add>, %51, %cst_20 [1] : vector<16x128xf32> to vector<16xf32>
    %53 = vector.shape_cast %52 : vector<16xf32> to vector<16x1xf32>
    %cst_21 = arith.constant 1.280000e+02 : f32
    %54 = vector.broadcast %cst_21 : f32 to vector<16x1xf32>
    %55 = arith.divf %53, %54 : vector<16x1xf32>
    %56 = vector.broadcast %55 : vector<16x1xf32> to vector<16x128xf32>
    %57 = arith.subf %51, %56 : vector<16x128xf32>
    %58 = vector.broadcast %55 : vector<16x1xf32> to vector<16x128xf32>
    %59 = arith.subf %51, %58 : vector<16x128xf32>
    %60 = arith.mulf %57, %59 : vector<16x128xf32>
    %cst_22 = arith.constant dense<0.000000e+00> : vector<16xf32>
    %61 = vector.multi_reduction <add>, %60, %cst_22 [1] : vector<16x128xf32> to vector<16xf32>
    %62 = vector.shape_cast %61 : vector<16xf32> to vector<16x1xf32>
    %cst_23 = arith.constant 1.280000e+02 : f32
    %63 = vector.broadcast %cst_23 : f32 to vector<16x1xf32>
    %64 = arith.divf %62, %63 : vector<16x1xf32>
    %65 = vector.broadcast %55 : vector<16x1xf32> to vector<16x128xf32>
    %66 = arith.subf %51, %65 : vector<16x128xf32>
    %cst_24 = arith.constant 9.99999974E-6 : f32
    %67 = vector.broadcast %cst_24 : f32 to vector<16x1xf32>
    %68 = arith.addf %64, %67 : vector<16x1xf32>
    %69 = math.rsqrt %68 : vector<16x1xf32>
    %70 = vector.broadcast %69 : vector<16x1xf32> to vector<16x128xf32>
    %71 = arith.mulf %66, %70 : vector<16x128xf32>
    %72 = vector.broadcast %14 : vector<1x128xf32> to vector<16x128xf32>
    %73 = arith.mulf %71, %72 : vector<16x128xf32>
    %74 = vector.broadcast %15 : vector<1x128xf32> to vector<16x128xf32>
    %75 = arith.addf %73, %74 : vector<16x128xf32>
    %cst_25 = arith.constant dense<0.000000e+00> : vector<16x128xf32>
    %76 = tpu.matmul %75, %6, %cst_25 {dimension_numbers = #tpu.dot_dimension_numbers<[1], [0], [0], [1], [0, 0, 1, 1], [], []>} : vector<16x128xf32>, vector<128x128xf32>, vector<16x128xf32> -> vector<16x128xf32>
    %77 = vector.broadcast %16 : vector<1x128xf32> to vector<16x128xf32>
    %78 = arith.addf %76, %77 : vector<16x128xf32>
    %cst_26 = arith.constant 0.000000e+00 : f32
    %79 = vector.broadcast %cst_26 : f32 to vector<16x128xf32>
    %80 = arith.maximumf %78, %79 : vector<16x128xf32>
    %cst_27 = arith.constant dense<0.000000e+00> : vector<16x128xf32>
    %81 = tpu.matmul %80, %8, %cst_27 {dimension_numbers = #tpu.dot_dimension_numbers<[1], [0], [0], [1], [0, 0, 1, 1], [], []>} : vector<16x128xf32>, vector<128x128xf32>, vector<16x128xf32> -> vector<16x128xf32>
    %82 = vector.broadcast %17 : vector<1x128xf32> to vector<16x128xf32>
    %83 = arith.addf %81, %82 : vector<16x128xf32>
    %c0_28 = arith.constant 0 : index
    %c0_29 = arith.constant 0 : index
    %84 = vector.load %arg4[%c0_28, %c0_29] : memref<16x128xf32, #tpu.memory_space<vmem>>, vector<16x128xf32>
    tpu.vector_store %arg4[%c0_28, %c0_29], %83 {strides = array<i32>} : memref<16x128xf32, #tpu.memory_space<vmem>>, vector<16x128xf32>,
    return
  }
  func.func @transform_0(%arg0: i32) -> (i32, i32) {
    %c0_i32 = arith.constant 0 : i32
    %c0_i32_0 = arith.constant 0 : i32
    return %arg0, %c0_i32 : i32, i32
  }
  func.func @transform_1(%arg0: i32) -> (i32, i32, i32) {
    %c0_i32 = arith.constant 0 : i32
    %c0_i32_0 = arith.constant 0 : i32
    %c0_i32_1 = arith.constant 0 : i32
    %c0_i32_2 = arith.constant 0 : i32
    return %c0_i32, %c0_i32_0, %c0_i32_1 : i32, i32, i32
  }
  func.func @transform_2(%arg0: i32) -> (i32, i32) {
    %c0_i32 = arith.constant 0 : i32
    %c0_i32_0 = arith.constant 0 : i32
    %c0_i32_1 = arith.constant 0 : i32
    return %c0_i32, %c0_i32_0 : i32, i32
  }
  func.func @transform_3(%arg0: i32) -> (i32, i32) {
    %c0_i32 = arith.constant 0 : i32
    %c0_i32_0 = arith.constant 0 : i32
    return %arg0, %c0_i32 : i32, i32
  }
}

</mosaic_0001>

<bundles_post_ra>
// kernel: tpu_custom_call.1
= control target key start
LH: loop header
LB: loop body
LE: loop exit
PB: predicated region body
PF: predicated region fallthrough
CT: control target
= control target key end

     0   :  { %8 = vsyncpa [#allocation3], 0  ;;  %s1103_s0 = inlined_call_operand.hbm [shape: f32[16,128], index: 0, kind: input, shape index: {}]   ;;  %s1104_s1 = inlined_call_operand.hbm [shape: f32[4,128,128], index: 1, kind: input, shape index: {}]   ;;  %s1105_s2 = inlined_call_operand.hbm [shape: f32[8,128], index: 2, kind: input, shape index: {}]   ;;  %s1106_s3 = inlined_call_operand.hbm [shape: f32[16,128], index: 3, kind: output, shape index: {}]  }
   0x1   :  { %9 = vsyncpa [#allocation6], 0 }
   0x2   :  { %10 = vsyncpa [#allocation4], 0  ;;  %s983_s12 = smov [#allocation5]   ;;  %s984_s14 = smov [#allocation2]  }
   0x3   :  { %s28_s13 = sshll.u32 %s983_s12, 4  ;;  %s16_s15 = sshll.u32 %s984_s14, 4  ;;  %s29_s13 = int_to_ptr.vmem [resolvable:$true] %s28_s13  ;;  %s1009_s15 = int_to_ptr.vmem [resolvable:$true] %s16_s15 }
   0x4   :  { %s889_s18 = scalar_lea.hbm %s1104_s1, 8192 }
   0x5   :  { %p890_p0 = scmp.ne.s32.totalorder %s1104_s1, %s889_s18  ;;  %p893_p1 = scmp.lt.u32.totalorder %s889_s18, %s1104_s1 }
   0x7   :  { %p895_p2 = pnand %p893_p1, %p890_p0 }
   0x9   :  { %898 = shalt.err (!%p895_p2)
}
   0xa   :  { %s899_s23 = scalar_lea.vmem %s29_s13, 8192  ;;  %p904_p4 = scmp.lt.s32.totalorder %s29_s13, %s29_s13 }
   0xb   :  { %p900_p3 = scmp.ne.s32.totalorder %s29_s13, %s899_s23  ;;  %p905_p5 = scmp.lt.s32.totalorder %s899_s23, %s899_s23 }
   0xd   :  { %p906_p6 = por %p905_p5, %p904_p4 }
   0xf   :  { %p907_p7 = pnand %p906_p6, %p900_p3 }
  0x11   :  { %910 = shalt.err (!%p907_p7)
}
  0x12   :  { %s985_s24 = smov 128   ;;  %s986_s25 = smov 8  }
  0x13   :  { %34 = dma.hbm_to_vmem [thread:$0]  %s1104_s1, 8192, %s29_s13, [#allocation6], %s985_s24, %s985_s24, %s986_s25  }
  0x14   :  { %s911_s30 = scalar_lea.hbm %s1103_s0, 256 }
  0x15   :  { %p912_p8 = scmp.ne.s32.totalorder %s1103_s0, %s911_s30  ;;  %p915_p9 = scmp.lt.u32.totalorder %s911_s30, %s1103_s0 }
  0x17   :  { %p917_p10 = pnand %p915_p9, %p912_p8 }
  0x19   :  { %920 = shalt.err (!%p917_p10)
}
  0x1a   :  { %s921_s8 = scalar_lea.vmem %s1009_s15, 256  ;;  %p926_p12 = scmp.lt.s32.totalorder %s1009_s15, %s1009_s15 }
  0x1b   :  { %p922_p11 = scmp.ne.s32.totalorder %s1009_s15, %s921_s8  ;;  %p927_p13 = scmp.lt.s32.totalorder %s921_s8, %s921_s8 }
  0x1d   :  { %p928_p0 = por %p927_p13, %p926_p12 }
  0x1f   :  { %p929_p1 = pnand %p928_p0, %p922_p11 }
  0x21   :  { %932 = shalt.err (!%p929_p1)
}
  0x22   :  { %22 = dma.hbm_to_vmem [thread:$0]  %s1103_s0, 256, %s1009_s15, [#allocation3], %s985_s24, %s985_s24, %s986_s25  }
  0x23   :  { %s987_s10 = smov [#allocation7]   ;;  %s933_s14 = scalar_lea.hbm %s1105_s2, 128 }
  0x24   :  { %s41_s11 = sshll.u32 %s987_s10, 4  ;;  %p934_p2 = scmp.ne.s32.totalorder %s1105_s2, %s933_s14  ;;  %s42_s11 = int_to_ptr.vmem [resolvable:$true] %s41_s11 }
  0x25   :  { %p937_p3 = scmp.lt.u32.totalorder %s933_s14, %s1105_s2 }
  0x27   :  { %p939_p4 = pnand %p937_p3, %p934_p2 }
  0x29   :  { %942 = shalt.err (!%p939_p4)
}
  0x2a   :  { %s943_s20 = scalar_lea.vmem %s42_s11, 128  ;;  %p948_p6 = scmp.lt.s32.totalorder %s42_s11, %s42_s11 }
  0x2b   :  { %p944_p5 = scmp.ne.s32.totalorder %s42_s11, %s943_s20  ;;  %p949_p7 = scmp.lt.s32.totalorder %s943_s20, %s943_s20 }
  0x2d   :  { %p950_p8 = por %p949_p7, %p948_p6 }
  0x2f   :  { %p951_p9 = pnand %p950_p8, %p944_p5 }
  0x31   :  { %954 = shalt.err (!%p951_p9)
}
  0x32   :  { %44 = dma.hbm_to_vmem [thread:$0]  %s1105_s2, 128, %s42_s11, [#allocation6]  }
  0x33   :  { %977 = dma.done.wait [#allocation3], 256  }
  0x34   :  { %978 = vsyncadd [#allocation3], 4294967040 }
  0x35   :  { %979 = dma.done.wait [#allocation6], 8320  }
  0x36   :  { %980 = vsyncadd [#allocation6], 4294958976  ;;  %v56_v0 = vld [vmem:[#allocation5] sm:$0xff]  ;;  %v57_v1 = vld [vmem:[#allocation5 + $0x8] sm:$0xff]  ;;  %v124_v26 = vlaneseq  ;;  %s988_s2 = smov [#allocation8]  }
  0x37   :  { %v58_v2 = vld [vmem:[#allocation5 + $0x10] sm:$0xff]  ;;  %v747_v3 = vpack.c.bf16 %v57_v1, %v56_v0  ;;  %v59_v4 = vld [vmem:[#allocation5 + $0x18] sm:$0xff]  ;;  %v60_v6 = vld [vmem:[#allocation5 + $0x20] sm:$0xff]  ;;  %s522_s21 = sshll.u32 %s988_s2, 4  ;;  %s523_s21 = int_to_ptr.vmem [resolvable:$true] %s522_s21 }
  0x38   :  { %v751_v5 = vpack.c.bf16 %v59_v4, %v58_v2  ;;  %v61_v7 = vld [vmem:[#allocation5 + $0x28] sm:$0xff]  ;;  %v54_v9 = vld [vmem:[#allocation2] sm:$0xff]  ;;  %v63_v11 = vld [vmem:[#allocation5 + $0x38] sm:$0xff]  ;;  %v1058_v27 = vshrl.u32 %v124_v26, 7  ;;  %s955_s22 = scalar_lea.vmem %s523_s21, 256  ;;  %p960_p11 = scmp.lt.s32.totalorder %s523_s21, %s523_s21 }
  0x39   :  { %748 = vmatprep.subr.bf16.mxu0 %v747_v3  ;;  %v755_v8 = vpack.c.bf16 %v61_v7, %v60_v6  ;;  %v62_v10 = vld [vmem:[#allocation5 + $0x30] sm:$0xff]  ;;  %639 = vmatprep.mubr.f32.mxu0 %v54_v9  ;;  %v64_v13 = vld [vmem:[#allocation5 + $0x40] sm:$0xff]  ;;  %v65_v14 = vld [vmem:[#allocation5 + $0x48] sm:$0xff]  ;;  %p956_p10 = scmp.ne.s32.totalorder %s523_s21, %s955_s22  ;;  %p961_p12 = scmp.lt.s32.totalorder %s955_s22, %s955_s22 }
  0x3a   :  { %750 = vmatpush3.bf16.msra.mxu0 %v747_v3  ;;  %v759_v12 = vpack.c.bf16 %v63_v11, %v62_v10  ;;  %v763_v15 = vpack.c.bf16 %v65_v14, %v64_v13  ;;  %v66_v16 = vld [vmem:[#allocation5 + $0x50] sm:$0xff]  ;;  %v67_v17 = vld [vmem:[#allocation5 + $0x58] sm:$0xff]  ;;  %v68_v19 = vld [vmem:[#allocation5 + $0x60] sm:$0xff]  ;;  %v126_v28 = vsub.s32 0, %v1058_v27  ;;  %v230_v11 = vsub.s32 1, %v1058_v27 }
  0x3b   :  { %752 = vmatprep.subr.bf16.mxu0 %v751_v5  ;;  %v767_v18 = vpack.c.bf16 %v67_v17, %v66_v16  ;;  %v69_v20 = vld [vmem:[#allocation5 + $0x68] sm:$0xff]  ;;  %v70_v22 = vld [vmem:[#allocation5 + $0x70] sm:$0xff]  ;;  %v71_v23 = vld [vmem:[#allocation5 + $0x78] sm:$0xff]  ;;  %p962_p13 = por %p961_p12, %p960_p11 }
  0x3c   :  { %v771_v21 = vpack.c.bf16 %v69_v20, %v68_v19  ;;  %v775_v24 = vpack.c.bf16 %v71_v23, %v70_v22  ;;  %v55_v25 = vld [vmem:[#allocation2 + $0x8] sm:$0xff]  ;;  %v1061_v29 = vld [vmem:[#allocation7] sm:$0xff]  ;;  %v74_v38 = vld [vmem:[#allocation5 + $0x88] sm:$0xff]  ;;  %v242_v23 = vsub.s32 3, %v1058_v27 }
  0x3d   :  { %v127_v30 = vrot.slane %v1061_v29, %v126_v28  ;;  %v73_v37 = vld [vmem:[#allocation5 + $0x80] sm:$0xff]  ;;  %v75_v39 = vld [vmem:[#allocation5 + $0x90] sm:$0xff]  ;;  %v76_v41 = vld [vmem:[#allocation5 + $0x98] sm:$0xff]  ;;  %v231_v13 = vrot.slane %v1061_v29, %v230_v11  ;;  %p963_p0 = pnand %p962_p13, %p956_p10 }
  0x3e   :  { %754 = vmatpush3.bf16.msra.mxu0 %v751_v5  ;;  %v779_v40 = vpack.c.bf16 %v74_v38, %v73_v37  ;;  %v783_v42 = vpack.c.bf16 %v76_v41, %v75_v39  ;;  %v77_v51 = vld [vmem:[#allocation5 + $0xa0] sm:$0xff]  ;;  %v78_v52 = vld [vmem:[#allocation5 + $0xa8] sm:$0xff]  ;;  %v79_v54 = vld [vmem:[#allocation5 + $0xb0] sm:$0xff] }
  0x3f   :  { %756 = vmatprep.subr.bf16.mxu0 %v755_v8  ;;  %v787_v53 = vpack.c.bf16 %v78_v52, %v77_v51  ;;  %v80_v55 = vld [vmem:[#allocation5 + $0xb8] sm:$0xff]  ;;  %v81_v57 = vld [vmem:[#allocation5 + $0xc0] sm:$0xff]  ;;  %v82_v58 = vld [vmem:[#allocation5 + $0xc8] sm:$0xff] }
  0x40   :  { %780 = vmatprep.subr.bf16.mxu1 %v779_v40  ;;  %v791_v56 = vpack.c.bf16 %v80_v55, %v79_v54  ;;  %v795_v59 = vpack.c.bf16 %v82_v58, %v81_v57  ;;  %v83_v60 = vld [vmem:[#allocation5 + $0xd0] sm:$0xff]  ;;  %v84_v61 = vld [vmem:[#allocation5 + $0xd8] sm:$0xff]  ;;  %v85_v62 = vld [vmem:[#allocation5 + $0xe0] sm:$0xff] }
  0x41   :  { %782 = vmatpush3.bf16.msra.mxu1 %v779_v40  ;;  %v799_v63 = vpack.c.bf16 %v84_v61, %v83_v60  ;;  %v86_v0 = vld [vmem:[#allocation5 + $0xe8] sm:$0xff]  ;;  %v87_v2 = vld [vmem:[#allocation5 + $0xf0] sm:$0xff]  ;;  %v88_v3 = vld [vmem:[#allocation5 + $0xf8] sm:$0xff] }
  0x42   :  { %758 = vmatpush3.bf16.msra.mxu0 %v755_v8  ;;  %784 = vmatprep.subr.bf16.mxu1 %v783_v42  ;;  %v803_v1 = vpack.c.bf16 %v86_v0, %v85_v62  ;;  %v807_v4 = vpack.c.bf16 %v88_v3, %v87_v2  ;;  %v93_v37 = vld [vmem:[#allocation5 + $0x118] sm:$0xff]  ;;  %v94_v39 = vld [vmem:[#allocation5 + $0x120] sm:$0xff]  ;;  %v95_v40 = vld [vmem:[#allocation5 + $0x128] sm:$0xff] }
  0x43   :  { %760 = vmatprep.subr.bf16.mxu0 %v759_v12  ;;  %v819_v41 = vpack.c.bf16 %v95_v40, %v94_v39  ;;  %v97_v51 = vld [vmem:[#allocation5 + $0x138] sm:$0xff]  ;;  %v99_v54 = vld [vmem:[#allocation5 + $0x148] sm:$0xff]  ;;  %v104_v62 = vld [vmem:[#allocation5 + $0x170] sm:$0xff] }
  0x44   :  { %v101_v57 = vld [vmem:[#allocation5 + $0x158] sm:$0xff]  ;;  %v103_v60 = vld [vmem:[#allocation5 + $0x168] sm:$0xff]  ;;  %v109_v3 = vld [vmem:[#allocation5 + $0x190] sm:$0xff] }
  0x45   :  { %786 = vmatpush3.bf16.msra.mxu1 %v783_v42  ;;  %v108_v2 = vld [vmem:[#allocation5 + $0x188] sm:$0xff]  ;;  %v114_v11 = vld [vmem:[#allocation5 + $0x1b8] sm:$0xff] }
  0x46   :  { %762 = vmatpush3.bf16.msra.mxu0 %v759_v12  ;;  %788 = vmatprep.subr.bf16.mxu1 %v787_v53  ;;  %v236_v12 = vsub.s32 2, %v1058_v27 }
  0x47   :  { %764 = vmatprep.subr.bf16.mxu0 %v763_v15 }
  0x48   :  { %v237_v16 = vrot.slane %v1061_v29, %v236_v12 }
  0x49   :  { %790 = vmatpush3.bf16.msra.mxu1 %v787_v53  ;;  %v98_v53 = vld [vmem:[#allocation5 + $0x140] sm:$0xff] }
  0x4a   :  { %766 = vmatpush3.bf16.msra.mxu0 %v763_v15  ;;  %792 = vmatprep.subr.bf16.mxu1 %v791_v56  ;;  %v827_v55 = vpack.c.bf16 %v99_v54, %v98_v53  ;;  %v438_v53 = vsub.s32 7, %v1058_v27 }
  0x4b   :  { %768 = vmatprep.subr.bf16.mxu0 %v767_v18 }
  0x4c   :  { %v439_v54 = vrot.slane %v1061_v29, %v438_v53 }
  0x4d   :  { %794 = vmatpush3.bf16.msra.mxu1 %v791_v56  ;;  %v100_v56 = vld [vmem:[#allocation5 + $0x150] sm:$0xff] }
  0x4e   :  { %770 = vmatpush3.bf16.msra.mxu0 %v767_v18  ;;  %796 = vmatprep.subr.bf16.mxu1 %v795_v59  ;;  %v831_v58 = vpack.c.bf16 %v101_v57, %v100_v56 }
  0x4f   :  { %772 = vmatprep.subr.bf16.mxu0 %v771_v21 }
  0x51   :  { %798 = vmatpush3.bf16.msra.mxu1 %v795_v59  ;;  %v102_v59 = vld [vmem:[#allocation5 + $0x160] sm:$0xff] }
  0x52   :  { %774 = vmatpush3.bf16.msra.mxu0 %v771_v21  ;;  %800 = vmatprep.subr.bf16.mxu1 %v799_v63  ;;  %v835_v61 = vpack.c.bf16 %v103_v60, %v102_v59 }
  0x53   :  { %776 = vmatprep.subr.bf16.mxu0 %v775_v24 }
  0x55   :  { %802 = vmatpush3.bf16.msra.mxu1 %v799_v63  ;;  %v105_v63 = vld [vmem:[#allocation5 + $0x178] sm:$0xff] }
  0x56   :  { %778 = vmatpush3.bf16.msra.mxu0 %v775_v24  ;;  %804 = vmatprep.subr.bf16.mxu1 %v803_v1  ;;  %v243_v24 = vrot.slane %v1061_v29, %v242_v23  ;;  %v839_v0 = vpack.c.bf16 %v105_v63, %v104_v62 }
  0x59   :  { %640 = vmatmul.mubr.f32.vlgmr.msra.gmra.mrb[0].mxu0 %v55_v25  ;;  %806 = vmatpush3.bf16.msra.mxu1 %v803_v1  ;;  %v107_v1 = vld [vmem:[#allocation5 + $0x180] sm:$0xff] }
  0x5a   :  { %808 = vmatprep.subr.bf16.mxu1 %v807_v4 }
  0x5d   :  { %810 = vmatpush3.bf16.msra.mxu1 %v807_v4  ;;  %v843_v4 = vpack.c.bf16 %v108_v2, %v107_v1 }
  0x5f   :  { %844 = vmatprep.subr.bf16.mxu1 %v843_v4 }
 0x12c   :  { %v641_v31 = vpop.f32.mrb[0].mxu0 }
 0x12d   :  { %v194_v32 = vpop.f32.mrb[1].mxu0  ;;  %v200_v34 = vadd.f32 %v641_v31, %v127_v30 }
 0x12e   :  { %v195_v33 = vadd.f32 %v194_v32, %v127_v30 }
 0x12f   :  { %v204_v36 = vmax.f32 %v200_v34, 0.0  ;;  %v91_v34 = vld [vmem:[#allocation5 + $0x108] sm:$0xff] }
 0x130   :  { %v203_v35 = vmax.f32 %v195_v33, 0.0  ;;  %v90_v33 = vld [vmem:[#allocation5 + $0x100] sm:$0xff] }
 0x132   :  { %205 = vadd.xlane.f32.xlu0 %v203_v35 }
 0x136   :  { %207 = vadd.xlane.f32.xlu0 %v204_v36 }
 0x1bf   :  { %v206_v43 = vpop.xlane.xlu0 %205 }
 0x1c0   :  { %v210_v44 = vmul.f32 0.0078125, %v206_v43 }
 0x1c2   :  { %v212_v45 = vsub.f32 %v203_v35, %v210_v44  ;;  %v92_v35 = vld [vmem:[#allocation5 + $0x110] sm:$0xff] }
 0x1c3   :  { %v208_v46 = vpop.xlane.xlu0 %207  ;;  %v815_v38 = vpack.c.bf16 %v93_v37, %v92_v35 }
 0x1c4   :  { %v211_v47 = vmul.f32 0.0078125, %v208_v46  ;;  %v214_v48 = vmul.f32 %v212_v45, %v212_v45 }
 0x1c6   :  { %v213_v49 = vsub.f32 %v204_v36, %v211_v47  ;;  %216 = vadd.xlane.f32.xlu1 %v214_v48  ;;  %v811_v36 = vpack.c.bf16 %v91_v34, %v90_v33 }
 0x1c8   :  { %v215_v50 = vmul.f32 %v213_v49, %v213_v49  ;;  %812 = vmatprep.subr.bf16.mxu0 %v811_v36 }
 0x1c9   :  { %814 = vmatpush3.bf16.msra.mxu0 %v811_v36 }
 0x1ca   :  { %218 = vadd.xlane.f32.xlu1 %v215_v50  ;;  %816 = vmatprep.subr.bf16.mxu0 %v815_v38  ;;  %v96_v50 = vld [vmem:[#allocation5 + $0x130] sm:$0xff] }
 0x1cb   :  { %v823_v52 = vpack.c.bf16 %v97_v51, %v96_v50 }
 0x1cd   :  { %818 = vmatpush3.bf16.msra.mxu0 %v815_v38 }
 0x1ce   :  { %820 = vmatprep.subr.bf16.mxu0 %v819_v41 }
 0x1d1   :  { %822 = vmatpush3.bf16.msra.mxu0 %v819_v41 }
 0x1d2   :  { %824 = vmatprep.subr.bf16.mxu0 %v823_v52 }
 0x1d5   :  { %826 = vmatpush3.bf16.msra.mxu0 %v823_v52 }
 0x1d6   :  { %828 = vmatprep.subr.bf16.mxu0 %v827_v55 }
 0x1d9   :  { %830 = vmatpush3.bf16.msra.mxu0 %v827_v55 }
 0x1da   :  { %832 = vmatprep.subr.bf16.mxu0 %v831_v58 }
 0x1dd   :  { %834 = vmatpush3.bf16.msra.mxu0 %v831_v58 }
 0x1de   :  { %836 = vmatprep.subr.bf16.mxu0 %v835_v61 }
 0x1e1   :  { %838 = vmatpush3.bf16.msra.mxu0 %v835_v61 }
 0x1e2   :  { %840 = vmatprep.subr.bf16.mxu0 %v839_v0 }
 0x1e5   :  { %842 = vmatpush3.bf16.msra.mxu0 %v839_v0 }
 0x253   :  { %v217_v5 = vpop.xlane.xlu1 %216 }
 0x254   :  { %v220_v6 = vmul.f32 0.0078125, %v217_v5  ;;  %v110_v5 = vld [vmem:[#allocation5 + $0x198] sm:$0xff] }
 0x256   :  { %v222_v7 = vadd.f32 1e-05, %v220_v6  ;;  %v847_v6 = vpack.c.bf16 %v110_v5, %v109_v3 }
 0x257   :  { %v219_v8 = vpop.xlane.xlu1 %218 }
 0x258   :  { %881 = vrsqrt.f32 %v222_v7  ;;  %v221_v9 = vmul.f32 0.0078125, %v219_v8  ;;  %v111_v7 = vld [vmem:[#allocation5 + $0x1a0] sm:$0xff]  ;;  %v112_v8 = vld [vmem:[#allocation5 + $0x1a8] sm:$0xff] }
 0x25a   :  { %v223_v10 = vadd.f32 1e-05, %v221_v9  ;;  %v851_v9 = vpack.c.bf16 %v112_v8, %v111_v7 }
 0x25c   :  { %883 = vrsqrt.f32 %v223_v10  ;;  %v113_v10 = vld [vmem:[#allocation5 + $0x1b0] sm:$0xff] }
 0x25d   :  { %v855_v12 = vpack.c.bf16 %v114_v11, %v113_v10 }
 0x262   :  { %v882_v14 = vpop.eup %881 }
 0x263   :  { %v226_v15 = vmul.f32 %v882_v14, %v212_v45  ;;  %v116_v14 = vld [vmem:[#allocation5 + $0x1c8] sm:$0xff] }
 0x265   :  { %v232_v17 = vmul.f32 %v231_v13, %v226_v15 }
 0x266   :  { %v884_v18 = vpop.eup %883 }
 0x267   :  { %v238_v19 = vadd.f32 %v237_v16, %v232_v17  ;;  %v227_v20 = vmul.f32 %v884_v18, %v213_v49  ;;  %v118_v17 = vld [vmem:[#allocation5 + $0x1d8] sm:$0xff] }
 0x269   :  { %674 = vmatprep.mubr.f32.mxu1 %v238_v19  ;;  %v233_v21 = vmul.f32 %v231_v13, %v227_v20  ;;  %v115_v13 = vld [vmem:[#allocation5 + $0x1c0] sm:$0xff]  ;;  %v120_v20 = vld [vmem:[#allocation5 + $0x1e8] sm:$0xff] }
 0x26a   :  { %v859_v15 = vpack.c.bf16 %v116_v14, %v115_v13  ;;  %v119_v19 = vld [vmem:[#allocation5 + $0x1e0] sm:$0xff] }
 0x26b   :  { %v239_v22 = vadd.f32 %v237_v16, %v233_v21  ;;  %v117_v16 = vld [vmem:[#allocation5 + $0x1d0] sm:$0xff]  ;;  %v867_v21 = vpack.c.bf16 %v120_v20, %v119_v19 }
 0x26c   :  { %v863_v18 = vpack.c.bf16 %v118_v17, %v117_v16 }
 0x26d   :  { %675 = vmatmul.mubr.f32.vlgmr.msra.gmra.mrb[0].mxu1 %v239_v22 }
 0x26e   :  { %846 = vmatpush3.bf16.msra.mxu1 %v843_v4 }
 0x26f   :  { %848 = vmatprep.subr.bf16.mxu1 %v847_v6 }
 0x272   :  { %850 = vmatpush3.bf16.msra.mxu1 %v847_v6 }
 0x273   :  { %852 = vmatprep.subr.bf16.mxu1 %v851_v9 }
 0x276   :  { %854 = vmatpush3.bf16.msra.mxu1 %v851_v9 }
 0x277   :  { %856 = vmatprep.subr.bf16.mxu1 %v855_v12 }
 0x27a   :  { %858 = vmatpush3.bf16.msra.mxu1 %v855_v12 }
 0x27b   :  { %860 = vmatprep.subr.bf16.mxu1 %v859_v15 }
 0x27e   :  { %862 = vmatpush3.bf16.msra.mxu1 %v859_v15 }
 0x27f   :  { %864 = vmatprep.subr.bf16.mxu1 %v863_v18 }
 0x282   :  { %866 = vmatpush3.bf16.msra.mxu1 %v863_v18 }
 0x283   :  { %868 = vmatprep.subr.bf16.mxu1 %v867_v21 }
 0x286   :  { %870 = vmatpush3.bf16.msra.mxu1 %v867_v21 }
 0x340   :  { %v676_v25 = vpop.f32.mrb[0].mxu1 }
 0x341   :  { %v316_v26 = vadd.f32 %v676_v25, %v243_v24  ;;  %v310_v28 = vpop.f32.mrb[1].mxu1 }
 0x342   :  { %v311_v30 = vadd.f32 %v310_v28, %v243_v24 }
 0x343   :  { %v320_v31 = vmax.f32 %v316_v26, 0.0 }
 0x344   :  { %v319_v32 = vmax.f32 %v311_v30, 0.0  ;;  %v345_v30 = vsub.s32 4, %v1058_v27 }
 0x345   :  { %323 = vadd.xlane.f32.xlu1 %v320_v31 }
 0x346   :  { %321 = vadd.xlane.f32.xlu0 %v319_v32 }
 0x3d2   :  { %v324_v42 = vpop.xlane.xlu1 %323 }
 0x3d3   :  { %v326_v43 = vmul.f32 0.0078125, %v324_v42  ;;  %v322_v44 = vpop.xlane.xlu0 %321  ;;  %v121_v42 = vld [vmem:[#allocation5 + $0x1f0] sm:$0xff] }
 0x3d4   :  { %v325_v45 = vmul.f32 0.0078125, %v322_v44 }
 0x3d5   :  { %v1070_v46 = vsub.f32 %v320_v31, %v326_v43  ;;  %v351_v31 = vsub.s32 5, %v1058_v27  ;;  %v122_v43 = vld [vmem:[#allocation5 + $0x1f8] sm:$0xff] }
 0x3d6   :  { %v1072_v47 = vsub.f32 %v319_v32, %v325_v45  ;;  %v346_v32 = vrot.slane %v1061_v29, %v345_v30  ;;  %v871_v44 = vpack.c.bf16 %v122_v43, %v121_v42  ;;  %v357_v45 = vsub.s32 6, %v1058_v27 }
 0x3d7   :  { %v330_v48 = vmul.f32 %v1070_v46, %v1070_v46  ;;  %v352_v37 = vrot.slane %v1061_v29, %v351_v31 }
 0x3d8   :  { %v329_v49 = vmul.f32 %v1072_v47, %v1072_v47  ;;  %872 = vmatprep.subr.bf16.mxu1 %v871_v44 }
 0x3d9   :  { %333 = vadd.xlane.f32.xlu1 %v330_v48  ;;  %874 = vmatpush3.bf16.msra.mxu1 %v871_v44  ;;  %v358_v48 = vrot.slane %v1061_v29, %v357_v45 }
 0x3da   :  { %331 = vadd.xlane.f32.xlu0 %v329_v49 }
 0x466   :  { %v334_v22 = vpop.xlane.xlu1 %333 }
 0x467   :  { %v336_v23 = vmul.f32 0.0078125, %v334_v22  ;;  %v332_v24 = vpop.xlane.xlu0 %331 }
 0x468   :  { %v335_v25 = vmul.f32 0.0078125, %v332_v24 }
 0x469   :  { %v338_v26 = vadd.f32 1e-05, %v336_v23 }
 0x46a   :  { %v337_v28 = vadd.f32 1e-05, %v335_v25 }
 0x46b   :  { %885 = vrsqrt.f32 %v338_v26 }
 0x46c   :  { %887 = vrsqrt.f32 %v337_v28 }
 0x475   :  { %v886_v33 = vpop.eup %885 }
 0x476   :  { %v888_v34 = vpop.eup %887  ;;  %v342_v35 = vmul.f32 %v886_v33, %v1070_v46 }
 0x477   :  { %v341_v36 = vmul.f32 %v888_v34, %v1072_v47 }
 0x478   :  { %v348_v38 = vmul.f32 %v346_v32, %v342_v35 }
 0x479   :  { %v347_v39 = vmul.f32 %v346_v32, %v341_v36 }
 0x47a   :  { %v354_v41 = vadd.f32 %v352_v37, %v348_v38 }
 0x47b   :  { %v353_v40 = vadd.f32 %v352_v37, %v347_v39 }
 0x47d   :  { %709 = vmatprep.mubr.f32.mxu0 %v353_v40 }
 0x47e   :  { %710 = vmatmul.mubr.f32.vlgmr.msra.gmra.mrb[2].mxu0 %v354_v41 }
 0x551   :  { %v711_v46 = vpop.f32.mrb[2].mxu0 }
 0x552   :  { %v431_v49 = vadd.f32 %v711_v46, %v358_v48  ;;  %v425_v47 = vpop.f32.mrb[3].mxu0 }
 0x553   :  { %v426_v50 = vadd.f32 %v425_v47, %v358_v48 }
 0x554   :  { %v435_v52 = vmax.f32 %v431_v49, 0.0 }
 0x555   :  { %v434_v51 = vmax.f32 %v426_v50, 0.0 }
 0x557   :  { %744 = vmatprep.mubr.f32.mxu1 %v434_v51 }
 0x558   :  { %745 = vmatmul.mubr.f32.vlgmr.msra.gmra.mrb[2].mxu1 %v435_v52 }
 0x62b   :  { %v746_v55 = vpop.f32.mrb[2].mxu1 }
 0x62c   :  { %v512_v56 = vadd.f32 %v746_v55, %v439_v54  ;;  %v506_v57 = vpop.f32.mrb[3].mxu1 }
 0x62d   :  { %v507_v58 = vadd.f32 %v506_v57, %v439_v54 }
 0x62e   :  { %516 = vst [vmem:[#allocation8 + $0x8] sm:$0xff] %v512_v56 }
 0x62f   :  { %515 = vst [vmem:[#allocation8] sm:$0xff] %v507_v58 }
 0x630   :  { %966 = shalt.err (!%p963_p0)
}
 0x631   :  { %s967_s27 = scalar_lea.hbm %s1106_s3, 256 }
 0x632   :  { %p968_p1 = scmp.ne.s32.totalorder %s1106_s3, %s967_s27  ;;  %p971_p2 = scmp.lt.u32.totalorder %s967_s27, %s1106_s3 }
 0x634   :  { %p973_p3 = pnand %p971_p2, %p968_p1 }
 0x636   :  { %976 = shalt.err (!%p973_p3)
}
 0x637   :  { %528 = dma.vmem_to_hbm [thread:$0]  %s523_s21, 256, %s1106_s3, [#allocation4], %s985_s24, %s985_s24, %s986_s25  }
 0x638   :  { %981 = dma.done.wait [#allocation4], 256  }
 0x639   :  { %982 = vsyncadd [#allocation4], 4294967040 }
 0x63a   :  { %532 = vsyncpa [#allocation3], 1 }
 0x63b   :  { %533 = vsyncpa [#allocation6], 1 }
 0x63c   :  { %534 = vsyncpa [#allocation4], 1 }

</bundles_post_ra>
